<compile_context>
chip_gen: v6e
topology: v6e:2x2x1
jax: 0.10.0
libtpu: 0.0.40
codegen_flags: <defaults>
</compile_context>

<pallas_src>
import jax
import jax.numpy as jnp
from jax import lax
from jax.experimental import pallas as pl
from jax.experimental.pallas import tpu as pltpu

# number of active quantizers per bandwidth_id (synthetic stand-in for
# quantizer.get_num_quantizers_for_bandwidth)
BANDWIDTHS = [1.5, 3.0, 6.0, 12.0]
NQ_FOR_BW = [1, 2, 4, 8]

LANE = 128


def _round_up(x, m):
    return (x + m - 1) // m * m


# -----------------------------------------------------------------------------
# Fused kernel.
#   grid = (N_tiles, num_q)   -- q innermost, residual carried in VMEM scratch
#   q == 0 : emb = patches @ W^T + b  -> residual scratch ; zero the output block
#   each q : nearest code (argmin ||c||^2 - 2 x.c), quant = cb[idx]
#            residual -= quant ; out += quant  (out block resident across q)
# -----------------------------------------------------------------------------
def _encodec_fused_kernel(p_ref, w_ref, b_ref, cb_ref, cbn_ref, out_ref, res_ref):
    q = pl.program_id(1)

    @pl.when(q == 0)
    def _():
        # fused conv proxy, seeded directly into the residual (no HBM round-trip)
        res_ref[...] = (
            jnp.dot(p_ref[...], w_ref[...], preferred_element_type=jnp.float32)
            + b_ref[...]
        )
        out_ref[...] = jnp.zeros_like(out_ref)

    res = res_ref[...]                          # (TN, Dp)
    cb = cb_ref[0]                              # (binsP, Dp)

    scores = lax.dot_general(                   # (TN, binsP) = res @ cb^T  (MXU)
        res, cb, (((1,), (1,)), ((), ())), preferred_element_type=jnp.float32
    )
    dist = cbn_ref[0] - 2.0 * scores            # ||c||^2 - 2 x.c (argmin-invariant)

    bins_p = dist.shape[-1]
    min_d = jnp.min(dist, axis=-1, keepdims=True)
    iota = lax.broadcasted_iota(jnp.int32, dist.shape, 1)
    # first index attaining the minimum (torch.argmin tie-break)
    idx = jnp.min(jnp.where(dist == min_d, iota, bins_p), axis=-1, keepdims=True)

    onehot = (iota == idx).astype(jnp.float32)                           # (TN, binsP)
    quant = jnp.dot(onehot, cb, preferred_element_type=jnp.float32)      # (TN, Dp)

    res_ref[...] = res - quant
    out_ref[...] += quant                       # sum_q quant_q == features


# -----------------------------------------------------------------------------
# Wrapper: layout prep (im2col / padding), one pallas_call, final transpose.
# -----------------------------------------------------------------------------
def encodec_features_forward(audio, conv_w, conv_b, codebooks, bandwidth_id, stride):
    B, T = audio.shape
    D, c_in, K = conv_w.shape
    assert c_in == 1
    num_q_total, bins, d2 = codebooks.shape
    assert d2 == D
    num_q = NQ_FOR_BW[bandwidth_id]

    L = (T - K) // stride + 1
    N = B * L

    # pad channel / codebook dims up to the 128-lane width; pad N to the tile
    Dp = _round_up(D, LANE)
    bins_p = _round_up(bins, LANE)
    TN = 512 if N >= 512 else _round_up(N, 8)          # f32 tiles stay well under
    Np = _round_up(N, TN)                               # scoped VMEM on v5e/v6e/v7x

    # --- patches (im2col); stride == K is a pure reshape, no gather needed ---
    if stride == K:
        patches = audio[:, : L * stride].reshape(N, K)
    else:
        gidx = jnp.arange(L)[:, None] * stride + jnp.arange(K)[None, :]
        patches = audio[:, gidx].reshape(N, K)
    patches = jnp.pad(patches, ((0, Np - N), (0, 0)))                       # (Np, K)

    w_t = jnp.pad(conv_w.reshape(D, K).T, ((0, 0), (0, Dp - D)))            # (K, Dp)
    bias = jnp.pad(conv_b.reshape(1, D), ((0, 0), (0, Dp - D)))             # (1, Dp)

    cb = codebooks[:num_q]                                                  # (num_q, bins, D)
    cb_p = jnp.pad(cb, ((0, 0), (0, bins_p - bins), (0, Dp - D)))           # (num_q, binsP, Dp)
    cb_norm = jnp.sum(cb * cb, axis=-1)                                     # (num_q, bins)
    # padded codebook rows get a huge norm so they can never win the argmin
    cbn_p = jnp.pad(cb_norm, ((0, 0), (0, bins_p - bins)),
                    constant_values=1e30)[:, None, :]                       # (num_q, 1, binsP)

    grid = (Np // TN, num_q)

    feats = pl.pallas_call(
        _encodec_fused_kernel,
        out_shape=jax.ShapeDtypeStruct((Np, Dp), jnp.float32),
        grid=grid,
        in_specs=[
            pl.BlockSpec((TN, K), lambda i, q: (i, 0)),         # patches
            pl.BlockSpec((K, Dp), lambda i, q: (0, 0)),         # conv weight^T
            pl.BlockSpec((1, Dp), lambda i, q: (0, 0)),         # conv bias
            pl.BlockSpec((1, bins_p, Dp), lambda i, q: (q, 0, 0)),   # codebook[q]
            pl.BlockSpec((1, 1, bins_p), lambda i, q: (q, 0, 0)),    # ||codebook[q]||^2
        ],
        out_specs=pl.BlockSpec((TN, Dp), lambda i, q: (i, 0)),
        scratch_shapes=[pltpu.VMEM((TN, Dp), jnp.float32)],     # residual carry
        compiler_params=pltpu.CompilerParams(
            dimension_semantics=("parallel", "arbitrary"),
            vmem_limit_bytes=32 * 1024 * 1024,
        ),
    )(patches, w_t, bias, cb_p, cbn_p)

    # NOTE: at production sizes consider bf16 operands for the two MXU matmuls
    # (f32 accumulate) on v6e/v7x; kept f32 here so code selection matches the
    # f32 reference exactly.
    feats = feats[:N, :D].reshape(B, L, D)
    return jnp.transpose(feats, (0, 2, 1))      # (B, D, L), like torch .transpose(1, 2)


# -----------------------------------------------------------------------------
# Pure-JAX reference (mirrors the torch semantics)
# -----------------------------------------------------------------------------
def reference_forward(audio, conv_w, conv_b, codebooks, bandwidth_id, stride):
    B, T = audio.shape
    D, _, K = conv_w.shape
    num_q_total, bins, _ = codebooks.shape
    num_q = NQ_FOR_BW[bandwidth_id]
    L = (T - K) // stride + 1

    gidx = jnp.arange(L)[:, None] * stride + jnp.arange(K)[None, :]
    patches = audio[:, gidx].reshape(B * L, K)
    emb = patches @ conv_w.reshape(D, K).T + conv_b[None, :]

    res = emb
    codes = []
    for q in range(num_q):
        cb = codebooks[q]
        dist = jnp.sum(cb * cb, -1)[None, :] - 2.0 * (res @ cb.T)
        idx = jnp.argmin(dist, axis=-1)
        codes.append(idx)
        res = res - cb[idx]
    codes = jnp.stack(codes)                                         # (num_q, B*L)

    cbw = codebooks.reshape(num_q_total * bins, D)
    offsets = jnp.arange(num_q) * bins
    feats = cbw[codes + offsets[:, None]].sum(0)                     # (B*L, D)
    return jnp.transpose(feats.reshape(B, L, D), (0, 2, 1))          # (B, D, L)


if __name__ == "__main__":
    key = jax.random.PRNGKey(0)
    k1, k2, k3, k4 = jax.random.split(key, 4)

    B, T = 2, 64            # batch, audio samples
    K, STRIDE = 4, 4        # conv kernel / stride  -> L = 16 frames
    D = 32                  # encoder / codebook dimension
    BINS = 64               # codes per codebook ("quantizer.bins")
    NUM_Q_TOTAL = 8         # quantizers at max bandwidth
    bandwidth_id = 2        # -> 4 active quantizers

    audio = jax.random.normal(k1, (B, T), jnp.float32)
    conv_w = jax.random.normal(k2, (D, 1, K), jnp.float32) * 0.1
    conv_b = jax.random.normal(k3, (D,), jnp.float32) * 0.01
    codebooks = jax.random.normal(k4, (NUM_Q_TOTAL, BINS, D), jnp.float32)

    out = encodec_features_forward(audio, conv_w, conv_b, codebooks, bandwidth_id, STRIDE)
    out = jax.block_until_ready(out)

    L = (T - K) // STRIDE + 1
    assert out.shape == (B, D, L), out.shape
    ref = reference_forward(audio, conv_w, conv_b, codebooks, bandwidth_id, STRIDE)
    assert jnp.allclose(out, ref, atol=1e-3, rtol=1e-3), float(jnp.max(jnp.abs(out - ref)))

    print("KERNEL_OK")
</pallas_src>

<mosaic_0001>
module attributes {stable_mosaic.version = 11 : i64} {
  func.func @_encodec_fused_kernel(%arg0: i32, %arg1: i32, %arg2: memref<32x4xf32, #tpu.memory_space<vmem>>, %arg3: memref<4x128xf32, #tpu.memory_space<vmem>>, %arg4: memref<1x128xf32, #tpu.memory_space<vmem>>, %arg5: memref<1x128x128xf32, #tpu.memory_space<vmem>>, %arg6: memref<1x1x128xf32, #tpu.memory_space<vmem>>, %arg7: memref<32x128xf32, #tpu.memory_space<vmem>>, %arg8: memref<32x128xf32, #tpu.memory_space<vmem>>) attributes {dimension_semantics = [#tpu.dimension_semantics<parallel>, #tpu.dimension_semantics<arbitrary>], iteration_bounds = array<i64: 1, 4>, scalar_prefetch = 0 : i64, scratch_operands = 1 : i64, tpu.core_type = #tpu.core_type<tc>, window_params = [{transform_indices = @transform_0, window_bounds = array<i64: 32, 4>}, {pipeline_mode = #tpu.pipeline_mode<synchronous>, transform_indices = @transform_1, window_bounds = array<i64: 4, 128>}, {pipeline_mode = #tpu.pipeline_mode<synchronous>, transform_indices = @transform_2, window_bounds = array<i64: 1, 128>}, {transform_indices = @transform_3, window_bounds = array<i64: 1, 128, 128>}, {transform_indices = @transform_4, window_bounds = array<i64: 1, 1, 128>}, {transform_indices = @transform_5, window_bounds = array<i64: 32, 128>}]} {
    %c0_i32 = arith.constant 0 : i32
    %0 = arith.cmpi eq, %arg1, %c0_i32 : i32
    %1 = arith.extui %0 : i1 to i32
    %c0_i32_0 = arith.constant 0 : i32
    %2 = arith.cmpi ne, %1, %c0_i32_0 : i32
    scf.if %2 {
      %c0_18 = arith.constant 0 : index
      %c0_19 = arith.constant 0 : index
      %32 = vector.load %arg2[%c0_18, %c0_19] : memref<32x4xf32, #tpu.memory_space<vmem>>, vector<32x4xf32>
      %c0_20 = arith.constant 0 : index
      %c0_21 = arith.constant 0 : index
      %33 = vector.load %arg3[%c0_20, %c0_21] : memref<4x128xf32, #tpu.memory_space<vmem>>, vector<4x128xf32>
      %cst_22 = arith.constant dense<0.000000e+00> : vector<32x128xf32>
      %34 = tpu.matmul %32, %33, %cst_22 {dimension_numbers = #tpu.dot_dimension_numbers<[1], [0], [0], [1], [0, 0, 1, 1], [], []>} : vector<32x4xf32>, vector<4x128xf32>, vector<32x128xf32> -> vector<32x128xf32>
      %c0_23 = arith.constant 0 : index
      %c0_24 = arith.constant 0 : index
      %35 = vector.load %arg4[%c0_23, %c0_24] : memref<1x128xf32, #tpu.memory_space<vmem>>, vector<1x128xf32>
      %36 = vector.broadcast %35 : vector<1x128xf32> to vector<32x128xf32>
      %37 = arith.addf %34, %36 : vector<32x128xf32>
      %c0_25 = arith.constant 0 : index
      %c0_26 = arith.constant 0 : index
      %38 = vector.load %arg8[%c0_25, %c0_26] : memref<32x128xf32, #tpu.memory_space<vmem>>, vector<32x128xf32>
      tpu.vector_store %arg8[%c0_25, %c0_26], %37 {strides = array<i32>} : memref<32x128xf32, #tpu.memory_space<vmem>>, vector<32x128xf32>,
      %cst_27 = arith.constant 0.000000e+00 : f32
      %39 = vector.broadcast %cst_27 : f32 to vector<32x128xf32>
      %c0_28 = arith.constant 0 : index
      %c0_29 = arith.constant 0 : index
      %40 = vector.load %arg7[%c0_28, %c0_29] : memref<32x128xf32, #tpu.memory_space<vmem>>, vector<32x128xf32>
      tpu.vector_store %arg7[%c0_28, %c0_29], %39 {strides = array<i32>} : memref<32x128xf32, #tpu.memory_space<vmem>>, vector<32x128xf32>,
    } else {
    }
    %c0 = arith.constant 0 : index
    %c0_1 = arith.constant 0 : index
    %3 = vector.load %arg8[%c0, %c0_1] : memref<32x128xf32, #tpu.memory_space<vmem>>, vector<32x128xf32>
    %c0_2 = arith.constant 0 : index
    %c0_3 = arith.constant 0 : index
    %c0_4 = arith.constant 0 : index
    %4 = vector.load %arg5[%c0_2, %c0_3, %c0_4] : memref<1x128x128xf32, #tpu.memory_space<vmem>>, vector<1x128x128xf32>
    %5 = vector.shape_cast %4 : vector<1x128x128xf32> to vector<128x128xf32>
    %cst = arith.constant dense<0.000000e+00> : vector<32x128xf32>
    %6 = tpu.matmul %3, %5, %cst {dimension_numbers = #tpu.dot_dimension_numbers<[1], [1], [0], [0], [0, 0, 1, 0], [], []>} : vector<32x128xf32>, vector<128x128xf32>, vector<32x128xf32> -> vector<32x128xf32>
    %c0_5 = arith.constant 0 : index
    %c0_6 = arith.constant 0 : index
    %c0_7 = arith.constant 0 : index
    %7 = vector.load %arg6[%c0_5, %c0_6, %c0_7] : memref<1x1x128xf32, #tpu.memory_space<vmem>>, vector<1x1x128xf32>
    %8 = vector.shape_cast %7 : vector<1x1x128xf32> to vector<1x128xf32>
    %cst_8 = arith.constant 2.000000e+00 : f32
    %9 = vector.broadcast %cst_8 : f32 to vector<32x128xf32>
    %10 = arith.mulf %9, %6 : vector<32x128xf32>
    %11 = vector.broadcast %8 : vector<1x128xf32> to vector<32x128xf32>
    %12 = arith.subf %11, %10 : vector<32x128xf32>
    %cst_9 = arith.constant dense<0x7F800000> : vector<32xf32>
    %13 = vector.multi_reduction <minimumf>, %12, %cst_9 [1] : vector<32x128xf32> to vector<32xf32>
    %14 = vector.shape_cast %13 : vector<32xf32> to vector<32x1xf32>
    %15 = tpu.iota {dimensions = array<i32: 1>} : vector<32x128xi32>
    %16 = vector.broadcast %14 : vector<32x1xf32> to vector<32x128xf32>
    %17 = arith.cmpf oeq, %12, %16 : vector<32x128xf32>
    %c128_i32 = arith.constant 128 : i32
    %18 = vector.broadcast %c128_i32 : i32 to vector<32x128xi32>
    %19 = arith.select %17, %15, %18 : vector<32x128xi1>, vector<32x128xi32>
    %cst_10 = arith.constant dense<2147483647> : vector<32xi32>
    %20 = vector.multi_reduction <minsi>, %19, %cst_10 [1] : vector<32x128xi32> to vector<32xi32>
    %21 = vector.shape_cast %20 : vector<32xi32> to vector<32x1xi32>
    %22 = vector.broadcast %21 : vector<32x1xi32> to vector<32x128xi32>
    %23 = arith.cmpi eq, %15, %22 : vector<32x128xi32>
    %24 = arith.extui %23 : vector<32x128xi1> to vector<32x128xi32>
    %25 = arith.sitofp %24 : vector<32x128xi32> to vector<32x128xf32>
    %cst_11 = arith.constant dense<0.000000e+00> : vector<32x128xf32>
    %26 = tpu.matmul %25, %5, %cst_11 {dimension_numbers = #tpu.dot_dimension_numbers<[1], [0], [0], [1], [0, 0, 1, 1], [], []>} : vector<32x128xf32>, vector<128x128xf32>, vector<32x128xf32> -> vector<32x128xf32>
    %27 = arith.subf %3, %26 : vector<32x128xf32>
    %c0_12 = arith.constant 0 : index
    %c0_13 = arith.constant 0 : index
    %28 = vector.load %arg8[%c0_12, %c0_13] : memref<32x128xf32, #tpu.memory_space<vmem>>, vector<32x128xf32>
    tpu.vector_store %arg8[%c0_12, %c0_13], %27 {strides = array<i32>} : memref<32x128xf32, #tpu.memory_space<vmem>>, vector<32x128xf32>,
    %c0_14 = arith.constant 0 : index
    %c0_15 = arith.constant 0 : index
    %29 = vector.load %arg7[%c0_14, %c0_15] : memref<32x128xf32, #tpu.memory_space<vmem>>, vector<32x128xf32>
    %30 = arith.addf %29, %26 : vector<32x128xf32>
    %c0_16 = arith.constant 0 : index
    %c0_17 = arith.constant 0 : index
    %31 = vector.load %arg7[%c0_16, %c0_17] : memref<32x128xf32, #tpu.memory_space<vmem>>, vector<32x128xf32>
    tpu.vector_store %arg7[%c0_16, %c0_17], %30 {strides = array<i32>} : memref<32x128xf32, #tpu.memory_space<vmem>>, vector<32x128xf32>,
    return
  }
  func.func @transform_0(%arg0: i32, %arg1: i32) -> (i32, i32) {
    %c0_i32 = arith.constant 0 : i32
    %c0_i32_0 = arith.constant 0 : i32
    return %arg0, %c0_i32 : i32, i32
  }
  func.func @transform_1(%arg0: i32, %arg1: i32) -> (i32, i32) {
    %c0_i32 = arith.constant 0 : i32
    %c0_i32_0 = arith.constant 0 : i32
    %c0_i32_1 = arith.constant 0 : i32
    return %c0_i32, %c0_i32_0 : i32, i32
  }
  func.func @transform_2(%arg0: i32, %arg1: i32) -> (i32, i32) {
    %c0_i32 = arith.constant 0 : i32
    %c0_i32_0 = arith.constant 0 : i32
    %c0_i32_1 = arith.constant 0 : i32
    return %c0_i32, %c0_i32_0 : i32, i32
  }
  func.func @transform_3(%arg0: i32, %arg1: i32) -> (i32, i32, i32) {
    %c0_i32 = arith.constant 0 : i32
    %c0_i32_0 = arith.constant 0 : i32
    %c0_i32_1 = arith.constant 0 : i32
    return %arg1, %c0_i32, %c0_i32_0 : i32, i32, i32
  }
  func.func @transform_4(%arg0: i32, %arg1: i32) -> (i32, i32, i32) {
    %c0_i32 = arith.constant 0 : i32
    %c0_i32_0 = arith.constant 0 : i32
    %c0_i32_1 = arith.constant 0 : i32
    return %arg1, %c0_i32, %c0_i32_0 : i32, i32, i32
  }
  func.func @transform_5(%arg0: i32, %arg1: i32) -> (i32, i32) {
    %c0_i32 = arith.constant 0 : i32
    %c0_i32_0 = arith.constant 0 : i32
    return %arg0, %c0_i32 : i32, i32
  }
}

</mosaic_0001>

<bundles_post_ra>
// kernel: tpu_custom_call.1
= control target key start
LH: loop header
LB: loop body
LE: loop exit
PB: predicated region body
PF: predicated region fallthrough
CT: control target
= control target key end

     0   :  { %10 = vsyncpa [#allocation4], 0  ;;  %s1380_s0 = inlined_call_operand.vmem [shape: f32[32,4], index: 0, kind: input, shape index: {}]   ;;  %s1381_s1 = inlined_call_operand.vmem [shape: f32[4,128], index: 1, kind: input, shape index: {}]   ;;  %s1382_s2 = inlined_call_operand.vmem [shape: f32[1,128], index: 2, kind: input, shape index: {}]   ;;  %s1383_s3 = inlined_call_operand.hbm [shape: f32[4,128,128], index: 3, kind: input, shape index: {}]   ;;  %s1384_s4 = inlined_call_operand.vmem [shape: f32[4,1,128], index: 4, kind: input, shape index: {}]   ;;  %s1385_s5 = inlined_call_operand.hbm [shape: f32[32,128], index: 5, kind: output, shape index: {}]  }
   0x1   :  { %12 = vsyncpa [#allocation4 + $0x1], 0 }
   0x2   :  { %13 = vsyncpa [#allocation5], 0  ;;  %s1194_s18 = smov 0   ;;  %s1196_s19 = smov 0  }
   0x3   :  { %s1198_s20 = smov 0   ;;  %s1200_s21 = smov 0  }
   0x4   :  { %s1202_s22 = smov 0   ;;  %s1204_s23 = smov 0  }
   0x5 LB: > { %s819_s24 = sadd.s32 4294967295, %s1154_s23   ;;  %s28_s25 = sadd.s32 1, %s1150_s22  ;;  %s1154_s23 = sphi %s1204_s23, %s19_s23   ;;  %s1150_s22 = sphi %s1202_s22, %s1394_s22   ;;  %s1146_s21 = sphi %s1200_s21, %s1393_s21   ;;  %s1142_s20 = sphi %s1198_s20, %s1392_s20   ;;  %s1138_s19 = sphi %s1196_s19, %s1391_s19   ;;  %s1134_s18 = sphi %s1194_s18, %s1390_s18  }
   0x6   : > { %p29_p0 = scmp.ge.s32.totalorder %s28_s25, 4  ;;  %s106_s26 = sadd.s32 1, %s1142_s20 }
   0x7   : > { %p113_p1 = scmp.ne.s32.totalorder %s1142_s20, %s1138_s19  ;;  %p114_p2 = scmp.eq.s32.totalorder %s1154_s23, 0 }
   0x8   : > { %s1396_s25 = smov (%p29_p0, %s28_s25), 0  ;;  %p119_p4 = scmp.ne.s32.totalorder %s1138_s19, %s1134_s18 }
   0x9   : > { %p1230_p3 = por %p114_p2, %p113_p1  ;;  %s103_s28 = ssub.s32 %s1150_s22, %s1396_s25 }
   0xa   : > { %p120_p5 = scmp.eq.s32.totalorder %s819_s24, 0  ;;  %p104_p6 = scmp.eq.s32.totalorder %s103_s28, 0 }
   0xb   : > { %p990_p8 = scmp.lt.s32.totalorder %s1154_s23, 4  ;;  %s210_s6 = sand.u32 1, %s1142_s20  }
   0xc   : > { %p1239_p7 = por %p120_p5, %p119_p4  ;;  %s848_s7 = sshll.u32 %s1150_s22, 11 }
   0xd   : > { %s1245_s30 = scalar_select %p104_p6, %s1142_s20, %s106_s26  }
   0xe   : > { %s823_s8 = sshll.u32 %s210_s6, 7  ;;  %s220_s11 = scalar_lea.hbm %s1383_s3, %s848_s7 }
   0xf   : > { %s214_s12 = scalar_lea.vmem [#allocation3], %s823_s8  ;;  %p1254_p9 = pnand %p990_p8, %p1230_p3 }
  0x10   : > { %s221_s13 = sshll.u32 %s214_s12, 4  ;;  %s211_s15 = scalar_lea.sflag [#allocation4], %s210_s6  ;;  %s222_s13 = int_to_ptr.vmem [resolvable:$true] %s221_s13 }
  0x11   : > { %p1050_p10 = pneg %p1254_p9  ;;  %s1061_s16 = scalar_lea.vmem %s222_s13, 2048 }
  0x12   : > { %p1062_p11 = scmp.ne.s32.totalorder %s222_s13, %s1061_s16  ;;  %s1156_s17 = smov [#allocation3]  }
  0x13   : > { %s1066_s18 = sshll.u32 %s1156_s17, 4  ;;  %s1067_s18 = int_to_ptr.vmem [resolvable:$false] %s1066_s18 }
  0x14   : > { %p1064_p12 = pnand %p1062_p11, %p1050_p10  ;;  %s1068_s26 = scalar_lea.vmem %s1067_s18, 4096 }
  0x15   : > { %p1069_p0 = scmp.lt.s32.totalorder %s222_s13, %s1067_s18  ;;  %p1070_p1 = scmp.lt.s32.totalorder %s1068_s26, %s1061_s16 }
  0x16   : > { %p1065_p13 = pneg %p1064_p12 }
  0x17   : > { %p1071_p2 = por %p1070_p1, %p1069_p0 }
  0x19   : > { %p1072_p3 = pnand %p1071_p2, %p1065_p13 }
  0x1b   : > { %1075 = shalt.err (!%p1072_p3)
}
  0x1c   : > { %s1157_s27 = smov 128   ;;  %s1158_s28 = smov 8  }
  0x1d   : > { %989 = dma.hbm_to_vmem [thread:$0]  (!%p1254_p9), %s220_s11, 2048, %s222_s13, %s211_s15, %s1157_s27, %s1157_s27, %s1158_s28  }
  0x1e   : > { %p826_p4 = scmp.ge.s32.totalorder %s1154_s23, 1  ;;  %p235_p5 = scmp.lt.s32.totalorder %s1154_s23, 5 }
  0x20   : > { %p236_p6 = pnand %p826_p4, %p235_p5 }
  0x21   : > { %s241_s6 = sand.u32 (!%p236_p6), 1, %s1138_s19  }
  0x22   : > { %239 = sbr.rel (%p236_p6) target bundleno = 1152 (0x480), region = 40  ;;  %s827_s7 = sshll.u32 (!%p236_p6), %s241_s6, 7 }
  0x23   : > { %s242_s8 = scalar_lea.sflag (!%p236_p6), [#allocation4], %s241_s6  ;;  %s1265_s9 = scalar_lea.vmem (!%p236_p6), [#allocation3], %s827_s7 }
  0x27   : > { %1125 = dma.done.wait (%p1239_p7), %s242_s8, 2048  }
  0x28   : > { %1127 = vsyncadd (%p1239_p7), %s242_s8, 4294965248  ;;  %p281_p8 = scmp.lt.s32.totalorder %s1146_s21, 3  ;;  %p828_p9 = scmp.ne.s32.totalorder %s1146_s21, 0 }
  0x2a   : > { %s1273_s10 = scalar_select %p281_p8, %s1146_s21, 3 }
  0x2b   : > { %288 = sbr.rel (%p828_p9) target bundleno = 250 (0xfa), region = 48 }
  0x2c   : > { %s283_s13 = scalar_lea.vmem %s1384_s4, %s1273_s10 }
  0x30   : > { %v293_v0 = vld [vmem:[%s1381_s1] sm:$0xf]  ;;  %vm314_vm0 = vcmask 1043456   ;;  %vm301_vm1 = vcmask 31744   ;;  %v291_v2 = vld [vmem:[%s1380_s0 + $0x10] sm:$0xff]  ;;  %v290_v3 = vld [vmem:[%s1380_s0 + $0x8] sm:$0xff] }
  0x31   : > { %v289_v1 = vld [vmem:[%s1380_s0] sm:$0xff]  ;;  %894 = vmatprep.subr.msk.mxu0 %vm314_vm0, %v293_v0  ;;  %978 = vmatprep.subr.msk.mxu1 %vm314_vm0, %v293_v0  ;;  %v292_v4 = vld [vmem:[%s1380_s0 + $0x18] sm:$0xff]  ;;  %v1159_v5 = vmov 0.0  }
  0x32   : > { %895 = vmatpush3.msk.msra.mxu0 %vm314_vm0, %v293_v0  ;;  %979 = vmatpush3.msk.msra.mxu1 %vm314_vm0, %v293_v0  ;;  %407 = vst [vmem:[#allocation6] sm:$0xff] %v1159_v5  ;;  %408 = vst [vmem:[#allocation6 + $0x8] sm:$0xff] %v1159_v5  ;;  %v829_v6 = vld [vmem:[%s1382_s2] ss:$0 sm:$0xff] }
  0x33   : > { %896 = vmatprep.mubr.msk.f32.mxu0 %vm301_vm1, %v289_v1  ;;  %899 = vmatprep.mubr.msk.f32.mxu1 %vm301_vm1, %v291_v2  ;;  %409 = vst [vmem:[#allocation6 + $0x10] sm:$0xff] %v1159_v5  ;;  %410 = vst [vmem:[#allocation6 + $0x18] sm:$0xff] %v1159_v5 }
  0x34   : > { %897 = vmatmul.mubr.msk.f32.vlgmr.msra.gmra.mxu0 %vm301_vm1, %v290_v3  ;;  %900 = vmatmul.mubr.msk.f32.vlgmr.msra.gmra.mxu1 %vm301_vm1, %v292_v4 }
  0xf4   : > { %v898_v7 = vpop.f32.mrf.mxu0  ;;  %v901_v8 = vpop.f32.mrf.mxu1 }
  0xf5   : > { %v390_v9 = vadd.f32 %v898_v7, %v829_v6  ;;  %v400_v10 = vadd.f32 %v901_v8, %v829_v6 }
  0xf6   : > { %v384_v11 = vpop.f32.mrf.mxu0  ;;  %v394_v12 = vpop.f32.mrf.mxu1 }
  0xf7   : > { %404 = vst [vmem:[#allocation2] sm:$0xff] %v390_v9  ;;  %406 = vst [vmem:[#allocation2 + $0x8] sm:$0xff] %v400_v10  ;;  %v385_v13 = vadd.f32 %v829_v6, %v384_v11  ;;  %v395_v14 = vadd.f32 %v829_v6, %v394_v12 }
  0xf9   : > { %403 = vst [vmem:[#allocation2 + $0x10] sm:$0xff] %v385_v13  ;;  %405 = vst [vmem:[#allocation2 + $0x18] sm:$0xff] %v395_v14 }
  0xfa PF: > { %v430_v15 = vld [vmem:[%s1265_s9 + $0x78] sm:$0xff]  ;;  %v429_v16 = vld [vmem:[%s1265_s9 + $0x70] sm:$0xff]  ;;  %v428_v17 = vld [vmem:[%s1265_s9 + $0x68] sm:$0xff]  ;;  %v539_v48 = vlaneseq  ;;  %s1161_s10 = smov [#allocation6]   ;;  %p1346_p7 = scmp.eq.s32.totalorder %s819_s24, 3 }
  0xfb   : > { %902 = vmatprep.subr.mxu0 %v430_v15  ;;  %940 = vmatprep.subr.mxu1 %v430_v15  ;;  %v427_v19 = vld [vmem:[%s1265_s9 + $0x60] sm:$0xff]  ;;  %v426_v20 = vld [vmem:[%s1265_s9 + $0x58] sm:$0xff]  ;;  %v425_v21 = vld [vmem:[%s1265_s9 + $0x50] sm:$0xff]  ;;  %s731_s11 = sshll.u32 %s1161_s10, 4  ;;  %s732_s11 = int_to_ptr.vmem [resolvable:$true] %s731_s11 }
  0xfc   : > { %903 = vmatpush3.xpose.msra.mxu0 %v430_v15  ;;  %941 = vmatpush3.msra.mxu1 %v430_v15  ;;  %v424_v22 = vld [vmem:[%s1265_s9 + $0x48] sm:$0xff]  ;;  %v423_v23 = vld [vmem:[%s1265_s9 + $0x40] sm:$0xff]  ;;  %v422_v24 = vld [vmem:[%s1265_s9 + $0x38] sm:$0xff]  ;;  %v1331_v49 = vand.u32 127, %v539_v48  ;;  %p1083_p13 = scmp.lt.s32.totalorder %s732_s11, %s732_s11 }
  0xfd   : > { %904 = vmatprep.subr.mxu0 %v429_v16  ;;  %942 = vmatprep.subr.mxu1 %v429_v16  ;;  %v421_v25 = vld [vmem:[%s1265_s9 + $0x30] sm:$0xff]  ;;  %v420_v26 = vld [vmem:[%s1265_s9 + $0x28] sm:$0xff]  ;;  %v419_v27 = vld [vmem:[%s1265_s9 + $0x20] sm:$0xff] }
  0xfe   : > { %943 = vmatpush3.msra.mxu1 %v429_v16  ;;  %v418_v28 = vld [vmem:[%s1265_s9 + $0x18] sm:$0xff]  ;;  %v417_v29 = vld [vmem:[%s1265_s9 + $0x10] sm:$0xff]  ;;  %v416_v30 = vld [vmem:[%s1265_s9 + $0x8] sm:$0xff] }
  0xff   : > { %944 = vmatprep.subr.mxu1 %v428_v17  ;;  %v415_v31 = vld [vmem:[%s1265_s9] sm:$0xff]  ;;  %v1323_v34 = vld [vmem:[#allocation2 + $0x8] sm:$0xff] }
 0x100   : > { %v1301_v18 = vld [vmem:[#allocation2 + $0x10] sm:$0xff]  ;;  %905 = vmatpush3.xpose.msra.mxu0 %v429_v16  ;;  %945 = vmatpush3.msra.mxu1 %v428_v17  ;;  %v1317_v32 = vld [vmem:[#allocation2] sm:$0xff]  ;;  %v1319_v33 = vld [vmem:[#allocation2 + $0x18] sm:$0xff] }
 0x101   : > { %934 = vmatprep.mubr.f32.mxu0 %v1301_v18  ;;  %906 = vmatprep.subr.mxu0 %v428_v17  ;;  %v835_v39 = vld [vmem:[%s283_s13] ss:$0 sm:$0xff]  ;;  %s1076_s13 = scalar_lea.vmem %s732_s11, 512 }
 0x102   : > { %946 = vmatprep.subr.mxu1 %v427_v19  ;;  %p1077_p10 = scmp.ne.s32.totalorder %s732_s11, %s1076_s13  ;;  %p1084_p0 = scmp.lt.s32.totalorder %s1076_s13, %s1076_s13 }
 0x103   : > { %947 = vmatpush3.msra.mxu1 %v427_v19 }
 0x104   : > { %907 = vmatpush3.xpose.msra.mxu0 %v428_v17  ;;  %948 = vmatprep.subr.mxu1 %v426_v20  ;;  %p1078_p11 = pnand %p1077_p10, %p1346_p7  ;;  %p1085_p1 = por %p1084_p0, %p1083_p13 }
 0x105   : > { %908 = vmatprep.subr.mxu0 %v427_v19  ;;  %949 = vmatpush3.msra.mxu1 %v426_v20 }
 0x106   : > { %950 = vmatprep.subr.mxu1 %v425_v21  ;;  %p1079_p12 = pneg %p1078_p11 }
 0x107   : > { %951 = vmatpush3.msra.mxu1 %v425_v21 }
 0x108   : > { %909 = vmatpush3.xpose.msra.mxu0 %v427_v19  ;;  %952 = vmatprep.subr.mxu1 %v424_v22  ;;  %p1086_p2 = pnand %p1085_p1, %p1079_p12 }
 0x109   : > { %910 = vmatprep.subr.mxu0 %v426_v20  ;;  %953 = vmatpush3.msra.mxu1 %v424_v22 }
 0x10a   : > { %954 = vmatprep.subr.mxu1 %v423_v23 }
 0x10b   : > { %955 = vmatpush3.msra.mxu1 %v423_v23 }
 0x10c   : > { %911 = vmatpush3.xpose.msra.mxu0 %v426_v20  ;;  %956 = vmatprep.subr.mxu1 %v422_v24 }
 0x10d   : > { %912 = vmatprep.subr.mxu0 %v425_v21  ;;  %957 = vmatpush3.msra.mxu1 %v422_v24 }
 0x10e   : > { %958 = vmatprep.subr.mxu1 %v421_v25 }
 0x10f   : > { %959 = vmatpush3.msra.mxu1 %v421_v25 }
 0x110   : > { %913 = vmatpush3.xpose.msra.mxu0 %v425_v21  ;;  %960 = vmatprep.subr.mxu1 %v420_v26 }
 0x111   : > { %914 = vmatprep.subr.mxu0 %v424_v22  ;;  %961 = vmatpush3.msra.mxu1 %v420_v26 }
 0x112   : > { %962 = vmatprep.subr.mxu1 %v419_v27 }
 0x113   : > { %963 = vmatpush3.msra.mxu1 %v419_v27 }
 0x114   : > { %915 = vmatpush3.xpose.msra.mxu0 %v424_v22  ;;  %964 = vmatprep.subr.mxu1 %v418_v28 }
 0x115   : > { %916 = vmatprep.subr.mxu0 %v423_v23  ;;  %965 = vmatpush3.msra.mxu1 %v418_v28 }
 0x116   : > { %966 = vmatprep.subr.mxu1 %v417_v29 }
 0x117   : > { %967 = vmatpush3.msra.mxu1 %v417_v29 }
 0x118   : > { %917 = vmatpush3.xpose.msra.mxu0 %v423_v23  ;;  %968 = vmatprep.subr.mxu1 %v416_v30 }
 0x119   : > { %918 = vmatprep.subr.mxu0 %v422_v24  ;;  %969 = vmatpush3.msra.mxu1 %v416_v30 }
 0x11a   : > { %970 = vmatprep.subr.mxu1 %v415_v31 }
 0x11b   : > { %971 = vmatpush3.msra.mxu1 %v415_v31 }
 0x11c   : > { %919 = vmatpush3.xpose.msra.mxu0 %v422_v24 }
 0x11d   : > { %920 = vmatprep.subr.mxu0 %v421_v25 }
 0x120   : > { %921 = vmatpush3.xpose.msra.mxu0 %v421_v25 }
 0x121   : > { %922 = vmatprep.subr.mxu0 %v420_v26 }
 0x124   : > { %923 = vmatpush3.xpose.msra.mxu0 %v420_v26 }
 0x125   : > { %924 = vmatprep.subr.mxu0 %v419_v27 }
 0x128   : > { %925 = vmatpush3.xpose.msra.mxu0 %v419_v27 }
 0x129   : > { %926 = vmatprep.subr.mxu0 %v418_v28 }
 0x12c   : > { %927 = vmatpush3.xpose.msra.mxu0 %v418_v28 }
 0x12d   : > { %928 = vmatprep.subr.mxu0 %v417_v29 }
 0x130   : > { %929 = vmatpush3.xpose.msra.mxu0 %v417_v29 }
 0x131   : > { %930 = vmatprep.subr.mxu0 %v416_v30 }
 0x134   : > { %931 = vmatpush3.xpose.msra.mxu0 %v416_v30 }
 0x135   : > { %932 = vmatprep.subr.mxu0 %v415_v31 }
 0x138   : > { %933 = vmatpush3.xpose.msra.mxu0 %v415_v31 }
 0x13b   : > { %935 = vmatmul.mubr.f32.vlgmr.msra.gmra.mxu0 %v1317_v32 }
 0x13c   : > { %937 = vmatprep.mubr.f32.mxu0 %v1319_v33 }
 0x13f   : > { %938 = vmatmul.mubr.f32.gmra.mxu0 %v1323_v34 }
 0x1fb   : > { %v936_v35 = vpop.f32.mrf.mxu0 }
 0x1fc   : > { %v518_v40 = vmul.f32 2.0, %v936_v35 }
 0x1fd   : > { %v497_v36 = vpop.f32.mrf.mxu0 }
 0x1fe   : > { %v517_v37 = vmul.f32 2.0, %v497_v36  ;;  %v528_v45 = vsub.f32 %v835_v39, %v518_v40  ;;  %v1160_v36 = vmov 1.0  }
 0x1ff   : > { %v939_v38 = vpop.f32.mrf.mxu0 }
 0x200   : > { %v527_v41 = vsub.f32 %v835_v39, %v517_v37  ;;  %v520_v44 = vmul.f32 2.0, %v939_v38 }
 0x201   : > { %v507_v42 = vpop.f32.mrf.mxu0 }
 0x202   : > { %v519_v43 = vmul.f32 2.0, %v507_v42  ;;  %531 = vmin.xlane.f32.xlu0 %v527_v41  ;;  %v530_v47 = vsub.f32 %v835_v39, %v520_v44 }
 0x204   : > { %v529_v46 = vsub.f32 %v835_v39, %v519_v43  ;;  %v711_v43 = vld [vmem:[#allocation6 + $0x8] sm:$0xff] }
 0x206   : > { %533 = vmin.xlane.f32.xlu0 %v528_v45  ;;  %535 = vmin.xlane.f32.xlu1 %v529_v46 }
 0x20a   : > { %537 = vmin.xlane.f32.xlu1 %v530_v47 }
 0x28b   : > { %v532_v50 = vpop.xlane.xlu0 %531 }
 0x28c   : > { %vm541_vm2 = vcmp.eq.f32.partialorder %v527_v41, %v532_v50  ;;  %v713_v50 = vld [vmem:[#allocation6 + $0x18] sm:$0xff] }
 0x28d   : > { %v545_v51 = vsel %vm541_vm2, %v1331_v49, 128 }
 0x28e   : > { %v550_v52 = vshra.s32 %v545_v51, 16  ;;  %v549_v2 = vand.u32 65535, %v545_v51 }
 0x28f   : > { %v534_v53 = vpop.xlane.xlu0 %533  ;;  %v536_v54 = vpop.xlane.xlu1 %535 }
 0x290   : > { %vm542_vm3 = vcmp.eq.f32.partialorder %v528_v45, %v534_v53  ;;  %vm543_vm4 = vcmp.eq.f32.partialorder %v529_v46, %v536_v54  ;;  %v552_v55 = vcvt.s32.f32 %v550_v52  ;;  %v551_v6 = vcvt.s32.f32 %v549_v2  ;;  %v710_v45 = vld [vmem:[#allocation6] sm:$0xff]  ;;  %v712_v54 = vld [vmem:[#allocation6 + $0x10] sm:$0xff] }
 0x291   : > { %v546_v56 = vsel %vm542_vm3, %v1331_v49, 128  ;;  %v547_v57 = vsel %vm543_vm4, %v1331_v49, 128 }
 0x292   : > { %553 = vmin.xlane.f32.xlu0 %v552_v55  ;;  %v564_v58 = vshra.s32 %v546_v56, 16  ;;  %v578_v59 = vshra.s32 %v547_v57, 16  ;;  %v563_v3 = vand.u32 65535, %v546_v56  ;;  %v577_v4 = vand.u32 65535, %v547_v57 }
 0x293   : > { %v538_v60 = vpop.xlane.xlu1 %537 }
 0x294   : > { %vm544_vm5 = vcmp.eq.f32.partialorder %v530_v47, %v538_v60  ;;  %v566_v61 = vcvt.s32.f32 %v564_v58  ;;  %v580_v62 = vcvt.s32.f32 %v578_v59  ;;  %v579_v11 = vcvt.s32.f32 %v577_v4 }
 0x295   : > { %v548_v63 = vsel %vm544_vm5, %v1331_v49, 128  ;;  %v565_v12 = vcvt.s32.f32 %v563_v3 }
 0x296   : > { %567 = vmin.xlane.f32.xlu1 %v566_v61  ;;  %581 = vmin.xlane.f32.xlu0 %v580_v62  ;;  %v592_v0 = vshra.s32 %v548_v63, 16  ;;  %v591_v8 = vand.u32 65535, %v548_v63 }
 0x298   : > { %v594_v1 = vcvt.s32.f32 %v592_v0  ;;  %v593_v16 = vcvt.s32.f32 %v591_v8 }
 0x29a   : > { %595 = vmin.xlane.f32.xlu1 %v594_v1 }
 0x31b   : > { %v554_v5 = vpop.xlane.xlu0 %553 }
 0x31c   : > { %vm555_vm6 = vcmp.eq.f32.partialorder %v552_v55, %v554_v5  ;;  %v560_v19 = vcvt.f32.s32 %v554_v5 }
 0x31d   : > { %v556_v7 = vsel %vm555_vm6, %v551_v6, inf }
 0x31e   : > { %557 = vmin.xlane.f32.xlu0 %v556_v7  ;;  %v561_v23 = vshll.u32 %v560_v19, 16 }
 0x31f   : > { %v582_v9 = vpop.xlane.xlu0 %581  ;;  %v568_v10 = vpop.xlane.xlu1 %567 }
 0x320   : > { %vm583_vm7 = vcmp.eq.f32.partialorder %v580_v62, %v582_v9  ;;  %vm569_vm8 = vcmp.eq.f32.partialorder %v566_v61, %v568_v10  ;;  %v588_v20 = vcvt.f32.s32 %v582_v9  ;;  %v574_v21 = vcvt.f32.s32 %v568_v10 }
 0x321   : > { %v584_v13 = vsel %vm583_vm7, %v579_v11, inf  ;;  %v570_v14 = vsel %vm569_vm8, %v565_v12, inf }
 0x322   : > { %585 = vmin.xlane.f32.xlu0 %v584_v13  ;;  %571 = vmin.xlane.f32.xlu1 %v570_v14  ;;  %v589_v26 = vshll.u32 %v588_v20, 16  ;;  %v575_v27 = vshll.u32 %v574_v21, 16 }
 0x323   : > { %v596_v15 = vpop.xlane.xlu1 %595 }
 0x324   : > { %vm597_vm9 = vcmp.eq.f32.partialorder %v594_v1, %v596_v15  ;;  %v602_v30 = vcvt.f32.s32 %v596_v15 }
 0x325   : > { %v598_v17 = vsel %vm597_vm9, %v593_v16, inf }
 0x326   : > { %599 = vmin.xlane.f32.xlu1 %v598_v17  ;;  %v603_v40 = vshll.u32 %v602_v30, 16 }
 0x3a7   : > { %v558_v22 = vpop.xlane.xlu0 %557 }
 0x3a8   : > { %v559_v24 = vcvt.f32.s32 %v558_v22 }
 0x3aa   : > { %v562_v25 = vadd.s32 %v561_v23, %v559_v24 }
 0x3ab   : > { %v586_v28 = vpop.xlane.xlu0 %585  ;;  %v572_v29 = vpop.xlane.xlu1 %571 }
 0x3ac   : > { %v587_v31 = vcvt.f32.s32 %v586_v28  ;;  %v573_v35 = vcvt.f32.s32 %v572_v29  ;;  %vm605_vm10 = vcmp.eq.s32.totalorder %v1331_v49, %v562_v25 }
 0x3ad   : > { %972 = vmatprep.mubr.msk.f32.mxu1 %vm605_vm10, %v1160_v36 }
 0x3ae   : > { %v590_v37 = vadd.s32 %v589_v26, %v587_v31  ;;  %v576_v38 = vadd.s32 %v575_v27, %v573_v35 }
 0x3af   : > { %v600_v39 = vpop.xlane.xlu1 %599 }
 0x3b0   : > { %v601_v41 = vcvt.f32.s32 %v600_v39  ;;  %vm606_vm11 = vcmp.eq.s32.totalorder %v1331_v49, %v576_v38  ;;  %vm607_vm12 = vcmp.eq.s32.totalorder %v1331_v49, %v590_v37 }
 0x3b1   : > { %973 = vmatmul.mubr.msk.f32.vlgmr.msra.gmra.mxu1 %vm606_vm11, %v1160_v36 }
 0x3b2   : > { %v604_v42 = vadd.s32 %v603_v40, %v601_v41  ;;  %975 = vmatprep.mubr.msk.f32.mxu1 %vm607_vm12, %v1160_v36 }
 0x3b4   : > { %vm608_vm13 = vcmp.eq.s32.totalorder %v1331_v49, %v604_v42 }
 0x3b5   : > { %976 = vmatmul.mubr.msk.f32.gmra.mxu1 %vm608_vm13, %v1160_v36 }
 0x471   : > { %v974_v44 = vpop.f32.mrf.mxu1 }
 0x472   : > { %v703_v46 = vsub.f32 %v1317_v32, %v974_v44  ;;  %v715_v47 = vadd.f32 %v974_v44, %v711_v43 }
 0x473   : > { %v683_v48 = vpop.f32.mrf.mxu1 }
 0x474   : > { %707 = vst [vmem:[#allocation2] sm:$0xff] %v703_v46  ;;  %719 = vst [vmem:[#allocation6 + $0x8] sm:$0xff] %v715_v47  ;;  %v702_v51 = vsub.f32 %v1301_v18, %v683_v48  ;;  %v714_v52 = vadd.f32 %v710_v45, %v683_v48 }
 0x475   : > { %v977_v53 = vpop.f32.mrf.mxu1 }
 0x476   : > { %706 = vst [vmem:[#allocation2 + $0x10] sm:$0xff] %v702_v51  ;;  %718 = vst [vmem:[#allocation6] sm:$0xff] %v714_v52  ;;  %v705_v49 = vsub.f32 %v1323_v34, %v977_v53  ;;  %v717_v55 = vadd.f32 %v977_v53, %v713_v50 }
 0x477   : > { %v693_v56 = vpop.f32.mrf.mxu1 }
 0x478   : > { %709 = vst [vmem:[#allocation2 + $0x8] sm:$0xff] %v705_v49  ;;  %721 = vst [vmem:[#allocation6 + $0x18] sm:$0xff] %v717_v55  ;;  %v704_v18 = vsub.f32 %v1319_v33, %v693_v56  ;;  %v716_v32 = vadd.f32 %v712_v54, %v693_v56 }
 0x47a   : > { %708 = vst [vmem:[#allocation2 + $0x18] sm:$0xff] %v704_v18  ;;  %720 = vst [vmem:[#allocation6 + $0x10] sm:$0xff] %v716_v32 }
 0x47b   : > { %1089 = shalt.err (!%p1086_p2)
}
 0x47c   : > { %s1162_s24 = smov 128   ;;  %s1163_s14 = smov 8  }
 0x47d   : > { %983 = dma.vmem_to_hbm [thread:$0]  (%p1346_p7), %s732_s11, 512, %s1385_s5, [#allocation5], %s1162_s24, %s1162_s24, %s1163_s14  }
 0x47e   : > { %1129 = dma.done.wait (%p1346_p7), [#allocation5], 512  }
 0x47f   : > { %1131 = vsyncadd (%p1346_p7), [#allocation5], 4294966784 }
 0x480 PF: > { %s19_s23 = sadd.s32 1, %s1154_s23   ;;  %s1390_s18 = smov %s1138_s19 }
 0x481   : > { %p16_p3 = scmp.ge.s32.totalorder %s19_s23, 6   ;;  %s1391_s19 = smov %s1142_s20 }
 0x482   : > { %s1392_s20 = smov %s1245_s30  ;;  %s1393_s21 = smov %s1150_s22 }
 0x483   : > { %s1394_s22 = smov %s1396_s25  ;;  %18 = sbr.rel (!%p16_p3) target bundleno = 5 (0x5), region = 88 }
 0x488   :  { %747 = vsyncpa [#allocation4], 1 }
 0x489   :  { %749 = vsyncpa [#allocation4 + $0x1], 1 }
 0x48a   :  { %750 = vsyncpa [#allocation5], 1 }
 0x48b   :  { %752 = vsyncpa [#allocation5 + $0x1], 1 }

</bundles_post_ra>
